<compile_context>
chip_gen: v5e
topology: v5e:2x2
jax: 0.10.0
libtpu: 0.0.40
codegen_flags: <defaults>
</compile_context>

<pallas_src>
import jax
import jax.numpy as jnp
from jax.experimental import pallas as pl
from jax.experimental.pallas import tpu as pltpu


# ---------------- problem sizes (small, synthetic) ----------------
B = 4     # batch
F = 8     # input_size
H = 32    # hidden_size  -> 4H = 128 fills one lane-width exactly


# ---------------- Pallas kernel ----------------
def lstm_cell_kernel(x_ref, h_ref, c_ref, w_ih_ref, w_hh_ref, b_ih_ref,
                     h_out_ref, c_out_ref):
    # Fused gate pre-activation: one lane-dense (B, 4H=128) result, no concat.
    z = (jnp.dot(x_ref[...], w_ih_ref[...], preferred_element_type=jnp.float32)
         + jnp.dot(h_ref[...], w_hh_ref[...], preferred_element_type=jnp.float32)
         + b_ih_ref[...])

    i, ig, fg, og = jnp.split(z, 4, axis=1)     # each (B, H)

    input_activation = jnp.tanh(i)
    input_gate = jax.nn.sigmoid(ig)
    forget_gate = jax.nn.sigmoid(fg + 1.0)
    output_gate = jax.nn.sigmoid(og)

    new_c = c_ref[...] * forget_gate + input_activation * input_gate
    new_h = jnp.tanh(new_c) * output_gate

    h_out_ref[...] = new_h.astype(h_out_ref.dtype)
    c_out_ref[...] = new_c.astype(c_out_ref.dtype)


def lstm_cell_forward(inputs, h0, c0, params):
    """inputs: (B, F); h0, c0: (B, H)  ->  (new_h, new_c), each (B, H)."""
    w_ih, b_ih, w_hh = params

    vmem = pl.BlockSpec(memory_space=pltpu.MemorySpace.VMEM)  # full array, VMEM-resident

    fn = pl.pallas_call(
        lstm_cell_kernel,
        out_shape=(jax.ShapeDtypeStruct((B, H), jnp.float32),
                   jax.ShapeDtypeStruct((B, H), jnp.float32)),
        in_specs=[vmem] * 6,
        out_specs=(vmem, vmem),
    )
    return fn(inputs, h0, c0, w_ih, w_hh, b_ih)


# ---------------- pure-JAX reference (for verification) ----------------
def lstm_cell_reference(inputs, h0, c0, params):
    w_ih, b_ih, w_hh = params
    hp = jax.lax.Precision.HIGHEST
    z = (jnp.dot(inputs, w_ih, precision=hp)
         + jnp.dot(h0, w_hh, precision=hp)
         + b_ih)
    i, ig, fg, og = jnp.split(z, 4, axis=1)
    new_c = c0 * jax.nn.sigmoid(fg + 1.0) + jnp.tanh(i) * jax.nn.sigmoid(ig)
    new_h = jnp.tanh(new_c) * jax.nn.sigmoid(og)
    return new_h, new_c


# ---------------- deterministic parameter init ----------------
def make_params(key):
    k_w, k_b, k_r = jax.random.split(key, 3)
    # input_map: Linear(F, 4H) -- xavier_uniform weight (stored pre-transposed
    # as (F, 4H)), uniform(-0.1, 0.1) bias.
    lim = float(jnp.sqrt(6.0 / (F + 4 * H)))
    w_ih = jax.random.uniform(k_w, (F, 4 * H), jnp.float32, -lim, lim)
    b_ih = jax.random.uniform(k_b, (1, 4 * H), jnp.float32, -0.1, 0.1)
    # recurrent_map: Linear(H, 4H, bias=False) -- (semi-)orthogonal weight.
    w_hh = jax.nn.initializers.orthogonal()(k_r, (H, 4 * H), jnp.float32)
    return (w_ih, b_ih, w_hh)


if __name__ == "__main__":
    key = jax.random.PRNGKey(0)
    k_x, k_h, k_c, k_p = jax.random.split(key, 4)

    inputs = jax.random.normal(k_x, (B, F), jnp.float32)
    h0 = jax.random.normal(k_h, (B, H), jnp.float32)
    c0 = jax.random.normal(k_c, (B, H), jnp.float32)
    params = make_params(k_p)

    new_h, new_c = lstm_cell_forward(inputs, h0, c0, params)
    new_h = jax.block_until_ready(new_h)
    new_c = jax.block_until_ready(new_c)

    ref_h, ref_c = lstm_cell_reference(inputs, h0, c0, params)

    assert new_h.shape == (B, H) and new_c.shape == (B, H)
    ok_h = jnp.allclose(new_h, ref_h, rtol=2e-3, atol=2e-3)
    ok_c = jnp.allclose(new_c, ref_c, rtol=2e-3, atol=2e-3)
    if not (ok_h and ok_c):
        err_h = jnp.max(jnp.abs(new_h - ref_h))
        err_c = jnp.max(jnp.abs(new_c - ref_c))
        raise AssertionError(f"mismatch: h max abs err={err_h}, c max abs err={err_c}")

    print("KERNEL_OK")
</pallas_src>

<mosaic_0001>
module attributes {stable_mosaic.version = 11 : i64} {
  func.func @lstm_cell_kernel(%arg0: memref<4x8xf32, #tpu.memory_space<vmem>>, %arg1: memref<4x32xf32, #tpu.memory_space<vmem>>, %arg2: memref<4x32xf32, #tpu.memory_space<vmem>>, %arg3: memref<8x128xf32, #tpu.memory_space<vmem>>, %arg4: memref<32x128xf32, #tpu.memory_space<vmem>>, %arg5: memref<1x128xf32, #tpu.memory_space<vmem>>, %arg6: memref<4x32xf32, #tpu.memory_space<vmem>>, %arg7: memref<4x32xf32, #tpu.memory_space<vmem>>) attributes {dimension_semantics = [], scalar_prefetch = 0 : i64, scratch_operands = 0 : i64, tpu.core_type = #tpu.core_type<tc>} {
    %c0 = arith.constant 0 : index
    %c0_0 = arith.constant 0 : index
    %0 = vector.load %arg0[%c0, %c0_0] : memref<4x8xf32, #tpu.memory_space<vmem>>, vector<4x8xf32>
    %c0_1 = arith.constant 0 : index
    %c0_2 = arith.constant 0 : index
    %1 = vector.load %arg3[%c0_1, %c0_2] : memref<8x128xf32, #tpu.memory_space<vmem>>, vector<8x128xf32>
    %cst = arith.constant dense<0.000000e+00> : vector<4x128xf32>
    %2 = tpu.matmul %0, %1, %cst {dimension_numbers = #tpu.dot_dimension_numbers<[1], [0], [0], [1], [0, 0, 1, 1], [], []>} : vector<4x8xf32>, vector<8x128xf32>, vector<4x128xf32> -> vector<4x128xf32>
    %c0_3 = arith.constant 0 : index
    %c0_4 = arith.constant 0 : index
    %3 = vector.load %arg1[%c0_3, %c0_4] : memref<4x32xf32, #tpu.memory_space<vmem>>, vector<4x32xf32>
    %c0_5 = arith.constant 0 : index
    %c0_6 = arith.constant 0 : index
    %4 = vector.load %arg4[%c0_5, %c0_6] : memref<32x128xf32, #tpu.memory_space<vmem>>, vector<32x128xf32>
    %cst_7 = arith.constant dense<0.000000e+00> : vector<4x128xf32>
    %5 = tpu.matmul %3, %4, %cst_7 {dimension_numbers = #tpu.dot_dimension_numbers<[1], [0], [0], [1], [0, 0, 1, 1], [], []>} : vector<4x32xf32>, vector<32x128xf32>, vector<4x128xf32> -> vector<4x128xf32>
    %6 = arith.addf %2, %5 : vector<4x128xf32>
    %c0_8 = arith.constant 0 : index
    %c0_9 = arith.constant 0 : index
    %7 = vector.load %arg5[%c0_8, %c0_9] : memref<1x128xf32, #tpu.memory_space<vmem>>, vector<1x128xf32>
    %8 = vector.broadcast %7 : vector<1x128xf32> to vector<4x128xf32>
    %9 = arith.addf %6, %8 : vector<4x128xf32>
    %10 = vector.extract_strided_slice %9 {offsets = [0, 0], sizes = [4, 32], strides = [1, 1]} : vector<4x128xf32> to vector<4x32xf32>
    %11 = vector.extract_strided_slice %9 {offsets = [0, 32], sizes = [4, 32], strides = [1, 1]} : vector<4x128xf32> to vector<4x32xf32>
    %12 = vector.extract_strided_slice %9 {offsets = [0, 64], sizes = [4, 32], strides = [1, 1]} : vector<4x128xf32> to vector<4x32xf32>
    %13 = vector.extract_strided_slice %9 {offsets = [0, 96], sizes = [4, 32], strides = [1, 1]} : vector<4x128xf32> to vector<4x32xf32>
    %14 = math.tanh %10 : vector<4x32xf32>
    %15 = arith.negf %11 : vector<4x32xf32>
    %16 = math.exp %15 : vector<4x32xf32>
    %cst_10 = arith.constant 1.000000e+00 : f32
    %17 = vector.broadcast %cst_10 : f32 to vector<4x32xf32>
    %18 = arith.addf %17, %16 : vector<4x32xf32>
    %19 = arith.divf %17, %18 : vector<4x32xf32>
    %cst_11 = arith.constant 1.000000e+00 : f32
    %20 = vector.broadcast %cst_11 : f32 to vector<4x32xf32>
    %21 = arith.addf %12, %20 : vector<4x32xf32>
    %22 = arith.negf %21 : vector<4x32xf32>
    %23 = math.exp %22 : vector<4x32xf32>
    %cst_12 = arith.constant 1.000000e+00 : f32
    %24 = vector.broadcast %cst_12 : f32 to vector<4x32xf32>
    %25 = arith.addf %24, %23 : vector<4x32xf32>
    %26 = arith.divf %24, %25 : vector<4x32xf32>
    %27 = arith.negf %13 : vector<4x32xf32>
    %28 = math.exp %27 : vector<4x32xf32>
    %cst_13 = arith.constant 1.000000e+00 : f32
    %29 = vector.broadcast %cst_13 : f32 to vector<4x32xf32>
    %30 = arith.addf %29, %28 : vector<4x32xf32>
    %31 = arith.divf %29, %30 : vector<4x32xf32>
    %c0_14 = arith.constant 0 : index
    %c0_15 = arith.constant 0 : index
    %32 = vector.load %arg2[%c0_14, %c0_15] : memref<4x32xf32, #tpu.memory_space<vmem>>, vector<4x32xf32>
    %33 = arith.mulf %32, %26 : vector<4x32xf32>
    %34 = arith.mulf %14, %19 : vector<4x32xf32>
    %35 = arith.addf %33, %34 : vector<4x32xf32>
    %36 = math.tanh %35 : vector<4x32xf32>
    %37 = arith.mulf %36, %31 : vector<4x32xf32>
    %c0_16 = arith.constant 0 : index
    %c0_17 = arith.constant 0 : index
    %38 = vector.load %arg6[%c0_16, %c0_17] : memref<4x32xf32, #tpu.memory_space<vmem>>, vector<4x32xf32>
    tpu.vector_store %arg6[%c0_16, %c0_17], %37 {strides = array<i32>} : memref<4x32xf32, #tpu.memory_space<vmem>>, vector<4x32xf32>,
    %c0_18 = arith.constant 0 : index
    %c0_19 = arith.constant 0 : index
    %39 = vector.load %arg7[%c0_18, %c0_19] : memref<4x32xf32, #tpu.memory_space<vmem>>, vector<4x32xf32>
    tpu.vector_store %arg7[%c0_18, %c0_19], %35 {strides = array<i32>} : memref<4x32xf32, #tpu.memory_space<vmem>>, vector<4x32xf32>,
    return
  }
}

</mosaic_0001>

<bundles_post_ra>
// kernel: tpu_custom_call.1
= control target key start
LH: loop header
LB: loop body
LE: loop exit
PB: predicated region body
PF: predicated region fallthrough
CT: control target
= control target key end

     0   :  { %13 = vsyncpa [#allocation3], 0  ;;  %s535_s0 = inlined_call_operand.hbm [shape: f32[4,8], index: 0, kind: input, shape index: {}]   ;;  %s536_s1 = inlined_call_operand.hbm [shape: f32[4,32], index: 1, kind: input, shape index: {}]   ;;  %s537_s2 = inlined_call_operand.hbm [shape: f32[4,32], index: 2, kind: input, shape index: {}]   ;;  %s538_s3 = inlined_call_operand.hbm [shape: f32[8,128], index: 3, kind: input, shape index: {}]   ;;  %s539_s4 = inlined_call_operand.hbm [shape: f32[32,128], index: 4, kind: input, shape index: {}]   ;;  %s540_s5 = inlined_call_operand.vmem [shape: f32[1,128], index: 5, kind: input, shape index: {}]   ;;  %s541_s6 = inlined_call_operand.hbm [shape: f32[4,32], index: 6, kind: output, shape index: {0}]   ;;  %s542_s7 = inlined_call_operand.hbm [shape: f32[4,32], index: 7, kind: output, shape index: {1}]  }
   0x1   :  { %14 = vsyncpa [#allocation6], 0 }
   0x2   :  { %15 = vsyncpa [#allocation9], 0 }
   0x3   :  { %16 = vsyncpa [#allocation4], 0  ;;  %s34_s26 = sshll.u32 %s536_s1, 4  ;;  %s35_s26 = int_to_ptr.hbm [resolvable:$true] %s34_s26 }
   0x4   :  { %17 = vsyncpa [#allocation13], 0  ;;  %s459_s27 = smov [#allocation5]   ;;  %s56_s8 = sshll.u32 %s538_s3, 4  ;;  %s57_s8 = int_to_ptr.hbm [resolvable:$true] %s56_s8 }
   0x5   :  { %s36_s28 = sshll.u32 %s459_s27, 4  ;;  %s460_s9 = smov [#allocation8]   ;;  %s37_s28 = int_to_ptr.vmem [resolvable:$true] %s36_s28 }
   0x6   :  { %39 = dma.hbm_to_vmem [thread:$0]  %s35_s26, 64, %s37_s28, [#allocation6]  }
   0x7   :  { %s58_s10 = sshll.u32 %s460_s9, 4  ;;  %s23_s13 = sshll.u32 %s535_s0, 4  ;;  %s59_s10 = int_to_ptr.vmem [resolvable:$true] %s58_s10  ;;  %s24_s13 = int_to_ptr.hbm [resolvable:$true] %s23_s13 }
   0x8   :  { %61 = dma.hbm_to_vmem [thread:$0]  %s57_s8, 128, %s59_s10, [#allocation9]  }
   0x9   :  { %s45_s15 = sshll.u32 %s537_s2, 4  ;;  %s461_s16 = smov [#allocation2]   ;;  %s46_s15 = int_to_ptr.hbm [resolvable:$true] %s45_s15 }
   0xa   :  { %s25_s17 = sshll.u32 %s461_s16, 4  ;;  %s462_s3 = smov [#allocation7]   ;;  %s26_s17 = int_to_ptr.vmem [resolvable:$true] %s25_s17 }
   0xb   :  { %28 = dma.hbm_to_vmem [thread:$0]  %s24_s13, 64, %s26_s17, [#allocation3]  }
   0xc   :  { %s47_s18 = sshll.u32 %s462_s3, 4  ;;  %s66_s21 = sshll.u32 %s539_s4, 4  ;;  %s48_s18 = int_to_ptr.vmem [resolvable:$true] %s47_s18  ;;  %s67_s21 = int_to_ptr.hbm [resolvable:$true] %s66_s21 }
   0xd   :  { %50 = dma.hbm_to_vmem [thread:$0]  %s46_s15, 64, %s48_s18, [#allocation6]  }
   0xe   :  { %s463_s0 = smov [#allocation10]   ;;  %s464_s23 = smov 128  }
   0xf   :  { %s68_s22 = sshll.u32 %s463_s0, 4  ;;  %s465_s24 = smov 8   ;;  %s69_s22 = int_to_ptr.vmem [resolvable:$true] %s68_s22 }
  0x10   :  { %74 = dma.hbm_to_vmem [thread:$0]  %s67_s21, 512, %s69_s22, [#allocation9], %s464_s23, %s464_s23, %s465_s24  }
  0x11   :  { %449 = dma.done.wait [#allocation3], 64  }
  0x12   :  { %450 = vsyncadd [#allocation3], 4294967232 }
  0x13   :  { %451 = dma.done.wait [#allocation6], 128  }
  0x14   :  { %452 = vsyncadd [#allocation6], 4294967168 }
  0x15   :  { %453 = dma.done.wait [#allocation9], 640  }
  0x16   :  { %454 = vsyncadd [#allocation9], 4294966656  ;;  %v103_v0 = vld [vmem:[#allocation10 + $0x18] sm:$0xff]  ;;  %v102_v1 = vld [vmem:[#allocation10 + $0x10] sm:$0xff]  ;;  %vm128_vm0 = vcmask 64512   ;;  %vm104_vm1 = vcmask 261120  }
  0x17   :  { %120 = vmatpush.msra.mxu0 %v103_v0  ;;  %v98_v2 = vld [vmem:[#allocation8] sm:$0xff]  ;;  %v101_v3 = vld [vmem:[#allocation10 + $0x8] sm:$0xff]  ;;  %v100_v5 = vld [vmem:[#allocation10] sm:$0xff]  ;;  %s467_s25 = smov 64   ;;  %s468_s26 = smov 96   ;;  %vm214_vm10 = vcmask 257024  }
  0x18   :  { %147 = vmatpush.msra.mxu1 %v98_v2  ;;  %v97_v4 = vld [vmem:[#allocation2] sm:$0xf]  ;;  %v99_v6 = vld [vmem:[#allocation5] sm:$0xf]  ;;  %v197_v40 = vld [vmem:[#allocation7] sm:$0xf] }
  0x19   :  { %121 = vmatpush.msra.mxu0 %v102_v1  ;;  %253 = vmatmul.msk.f32.vlgmr.msra.gmra.mxu1 %vm128_vm0, %v97_v4  ;;  %v268_v8 = vld [vmem:[%s540_s5] ss:$0 sm:$0xff]  ;;  %s466_s5 = smov 32   ;;  %s469_s27 = smov [#allocation12]  }
  0x1a   :  { %s233_s28 = sshll.u32 %s469_s27, 4  ;;  %s235_s8 = sshll.u32 %s542_s7, 4  ;;  %s234_s28 = int_to_ptr.vmem [resolvable:$true] %s233_s28  ;;  %s236_s8 = int_to_ptr.hbm [resolvable:$true] %s235_s8 }
  0x1b   :  { %122 = vmatpush.msra.mxu0 %v101_v3  ;;  %s470_s9 = smov [#allocation11]   ;;  %s224_s13 = sshll.u32 %s541_s6, 4  ;;  %s225_s13 = int_to_ptr.hbm [resolvable:$true] %s224_s13 }
  0x1c   :  { %s222_s10 = sshll.u32 %s470_s9, 4  ;;  %s223_s10 = int_to_ptr.vmem [resolvable:$true] %s222_s10 }
  0x1d   :  { %123 = vmatpush.msra.mxu0 %v100_v5 }
  0x1e   :  { %252 = vmatmul.msk.f32.vlgmr.msra.gmra.mxu0 %vm104_vm1, %v99_v6 }
  0x96   :  { %v149_v7 = vpop.f32.mrf.mxu1 }
  0x9b   :  { %v125_v9 = vpop.f32.mrf.mxu0 }
  0x9c   :  { %v150_v10 = vadd.f32 %v149_v7, %v125_v9 }
  0x9e   :  { %v156_v11 = vadd.f32 %v268_v8, %v150_v10 }
  0xa0   :  { %v254_v12 = vmul.f32 -1.442695, %v156_v11  ;;  %v177_v13 = vadd.f32 1.0, %v156_v11 }
  0xa2   :  { %269 = vpow2.f32 %v254_v12  ;;  %v255_v14 = vmul.f32 -1.442695, %v177_v13 }
  0xa4   :  { %271 = vpow2.f32 %v255_v14 }
  0xa8   :  { %v270_v15 = vpop.eup %269 }
  0xa9   :  { %v161_v16 = vadd.f32 1.0, %v270_v15 }
  0xaa   :  { %v272_v17 = vpop.eup %271 }
  0xab   :  { %273 = vrcp.f32 %v161_v16  ;;  %v181_v18 = vadd.f32 1.0, %v272_v17  ;;  %v173_v24 = vand.u32 2147483648, %v161_v16  ;;  %v171_v26 = vand.u32 2147483647, %v161_v16 }
  0xac   :  { %vm167_vm3 = vweird.f32 %v161_v16 }
  0xad   :  { %275 = vrcp.f32 %v181_v18  ;;  %v193_v28 = vand.u32 2147483648, %v181_v18  ;;  %v191_v31 = vand.u32 2147483647, %v181_v18  ;;  %v174_v32 = vor.u32 1.1754944e-38, %v173_v24 }
  0xae   :  { %vm172_vm6 = vcmp.eq.f32.partialorder %v171_v26, 8.507059e+37  ;;  %vm187_vm7 = vweird.f32 %v181_v18  ;;  %277 = vtanh.f32 %v156_v11 }
  0xaf   :  { %v194_v36 = vor.u32 1.1754944e-38, %v193_v28  ;;  %vm192_vm9 = vcmp.eq.f32.partialorder %v191_v31, 8.507059e+37 }
  0xb1   :  { %v274_v19 = vpop.eup %273 }
  0xb2   :  { %v163_v20 = vmul.f32 %v274_v19, %v161_v16  ;;  %vm168_vm2 = vweird.f32 %v274_v19 }
  0xb3   :  { %v276_v21 = vpop.eup %275  ;;  %vm169_vm5 = vmor %vm167_vm3, %vm168_vm2 }
  0xb4   :  { %v164_v22 = vsub.f32 1.0, %v163_v20  ;;  %v183_v23 = vmul.f32 %v276_v21, %v181_v18  ;;  %vm188_vm4 = vweird.f32 %v276_v21  ;;  %v278_v41 = vpop.eup %277 }
  0xb5   :  { %vm189_vm8 = vmor %vm187_vm7, %vm188_vm4 }
  0xb6   :  { %v165_v25 = vmul.f32 %v274_v19, %v164_v22  ;;  %v184_v27 = vsub.f32 1.0, %v183_v23 }
  0xb8   :  { %v166_v29 = vadd.f32 %v274_v19, %v165_v25  ;;  %v185_v30 = vmul.f32 %v276_v21, %v184_v27 }
  0xba   :  { %v170_v33 = vsel %vm169_vm5, %v274_v19, %v166_v29  ;;  %v186_v34 = vadd.f32 %v276_v21, %v185_v30 }
  0xbb   :  { %v175_v35 = vsel %vm172_vm6, %v174_v32, %v170_v33 }
  0xbc   :  { %210 = vrot.lane.b32.xlu1 %v175_v35, %s466_s5  ;;  %v190_v37 = vsel %vm189_vm8, %v276_v21, %v186_v34 }
  0xbd   :  { %v195_v38 = vsel %vm192_vm9, %v194_v36, %v190_v37 }
  0xbe   :  { %199 = vrot.lane.b32.xlu0 %v195_v38, %s467_s25 }
  0xc6   :  { %204 = vrot.lane.b32.xlu0 %v175_v35, %s468_s26 }
 0x12e   :  { %v211_v47 = vpop.permute.xlu1 %210 }
 0x130   :  { %v200_v39 = vpop.permute.xlu0 %199 }
 0x131   :  { %v202_v43 = vmul.f32 %v200_v39, %v197_v40 }
 0x138   :  { %v205_v42 = vpop.permute.xlu0 %204 }
 0x139   :  { %v207_v44 = vmul.f32 %v278_v41, %v205_v42 }
 0x13b   :  { %v208_v45 = vadd.f32 %v207_v44, %v202_v43 }
 0x13d   :  { %279 = vtanh.f32 %v208_v45  ;;  %216 = vst.msk [vmem:[#allocation12] sm:$0xf] %vm214_vm10, %v208_v45 }
 0x13e   :  { %238 = dma.vmem_to_hbm [thread:$0]  %s234_s28, 64, %s236_s8, [#allocation13]  }
 0x143   :  { %v280_v46 = vpop.eup %279 }
 0x144   :  { %v213_v48 = vmul.f32 %v280_v46, %v211_v47 }
 0x146   :  { %215 = vst.msk [vmem:[#allocation11] sm:$0xf] %vm214_vm10, %v213_v48 }
 0x147   :  { %227 = dma.vmem_to_hbm [thread:$0]  %s223_s10, 64, %s225_s13, [#allocation4]  }
 0x148   :  { %455 = dma.done.wait [#allocation4], 64  }
 0x149   :  { %456 = vsyncadd [#allocation4], 4294967232 }
 0x14a   :  { %457 = dma.done.wait [#allocation13], 64  }
 0x14b   :  { %458 = vsyncadd [#allocation13], 4294967232 }
 0x14c   :  { %247 = vsyncpa [#allocation3], 1 }
 0x14d   :  { %248 = vsyncpa [#allocation6], 1 }
 0x14e   :  { %249 = vsyncpa [#allocation9], 1 }
 0x14f   :  { %250 = vsyncpa [#allocation4], 1 }
 0x150   :  { %251 = vsyncpa [#allocation13], 1 }

</bundles_post_ra>
